<compile_context>
chip_gen: v5e
topology: v5e:2x2
jax: 0.10.0
libtpu: 0.0.40
codegen_flags: <defaults>
</compile_context>

<pallas_src>
import jax
import jax.numpy as jnp
from jax import lax
from jax.experimental import pallas as pl
from jax.experimental.pallas import tpu as pltpu


def _curvature_mlp_kernel(x_ref, w1_ref, b1_ref, w2_ref, b2_ref, o_ref):
    # x_ref: (TM, nfeat) f32, one contiguous HBM chunk per grid step.
    # Layer 1 on the MXU, transposed-RHS so nodes land on the lane axis:
    #   hT = relu(W1 @ x^T + b1), shape (nhid, TM), f32 accumulation.
    hT = lax.dot_general(
        w1_ref[...], x_ref[...],
        dimension_numbers=(((1,), (1,)), ((), ())),
        preferred_element_type=jnp.float32,
    )
    hT = jnp.maximum(hT + b1_ref[...], 0.0)        # b1 (nhid, 1) broadcasts over lanes

    # Layer 2 (nhid -> 1) on the VPU/XLU: per-node dot with w2 = mul + sublane reduce.
    o = jnp.sum(hT * w2_ref[...], axis=0, keepdims=True) + b2_ref[0]   # (1, TM)
    o_ref[...] = jax.nn.sigmoid(o).astype(o_ref.dtype)                 # lane-dense store


def _choose_tile(n, tm_max, target_tiles):
    """Lane-aligned row tile targeting ~`target_tiles` grid steps."""
    tm_max = max(128, (int(tm_max) // 128) * 128)        # guard arbitrary caps
    tm = pl.cdiv(pl.cdiv(n, max(1, int(target_tiles))), 128) * 128
    tm = max(128, min(tm, tm_max))
    if tm >= 512:
        tm = (tm // 256) * 256                           # full-width MXU passes on v6e/v7x
    return tm


def curvature_mlp(x, w1, b1, w2, b2, *, tm_max=16384, target_tiles=8):
    """x: (N, nfeat) f32; w1: (nhid, nfeat); b1: (nhid,); w2: (1, nhid); b2: (1,).

    Weights are in their native nn.Linear layouts. Returns sigmoid(MLP(x)), (N, 1) f32.
    tm_max=16384 keeps the per-tile VMEM footprint at ~22 MiB (see header); raise
    vmem_limit_bytes together with tm_max if you push it further.
    """
    n, nfeat = x.shape
    nhid = w1.shape[0]

    tm = _choose_tile(n, tm_max, target_tiles)
    num_tiles = pl.cdiv(n, tm)        # ragged last tile is handled by Pallas (padded lanes
    n_pad = num_tiles * tm            # are computed on garbage and sliced away below)

    b1_col = b1.reshape(nhid, 1).astype(jnp.float32)     # lane-broadcast column
    w2_col = w2.reshape(nhid, 1).astype(jnp.float32)     # fc2.weight as a column
    b2_s = b2.reshape(1).astype(jnp.float32)             # SMEM scalar

    out = pl.pallas_call(
        _curvature_mlp_kernel,
        out_shape=jax.ShapeDtypeStruct((1, n_pad), jnp.float32),
        grid=(num_tiles,),
        in_specs=[
            pl.BlockSpec((tm, nfeat), lambda i: (i, 0)),          # x: contiguous row tile
            pl.BlockSpec((nhid, nfeat), lambda i: (0, 0)),        # W1 (VMEM-resident)
            pl.BlockSpec((nhid, 1), lambda i: (0, 0)),            # b1
            pl.BlockSpec((nhid, 1), lambda i: (0, 0)),            # w2
            pl.BlockSpec(memory_space=pltpu.MemorySpace.SMEM),    # b2 scalar
        ],
        out_specs=pl.BlockSpec((1, tm), lambda i: (0, i)),        # lane-dense output slab
        compiler_params=pltpu.CompilerParams(
            dimension_semantics=("parallel",),                    # megacore sharding on v7x
            vmem_limit_bytes=32 * 1024 * 1024,
        ),
    )(x.astype(jnp.float32), w1.astype(jnp.float32), b1_col, w2_col, b2_s)

    return out[0, :n].reshape(n, 1)


def init_params(key, nfeat, nhid):
    """Deterministic init mirroring nn.Linear (uniform +/- 1/sqrt(fan_in)), native layouts."""
    k1, k2, k3, k4 = jax.random.split(key, 4)
    lim1 = 1.0 / (nfeat ** 0.5)
    lim2 = 1.0 / (nhid ** 0.5)
    w1 = jax.random.uniform(k1, (nhid, nfeat), jnp.float32, -lim1, lim1)  # fc1.weight
    b1 = jax.random.uniform(k2, (nhid,), jnp.float32, -lim1, lim1)        # fc1.bias
    w2 = jax.random.uniform(k3, (1, nhid), jnp.float32, -lim2, lim2)      # fc2.weight
    b2 = jax.random.uniform(k4, (1,), jnp.float32, -lim2, lim2)           # fc2.bias
    return w1, b1, w2, b2


def reference(x, w1, b1, w2, b2):
    h = jnp.maximum(x @ w1.T + b1, 0.0)
    return jax.nn.sigmoid(h @ w2.T + b2)


if __name__ == "__main__":
    nfeat, nhid, n = 16, 32, 300
    key = jax.random.PRNGKey(0)
    kx, kp = jax.random.split(key)
    x = jax.random.normal(kx, (n, nfeat), jnp.float32)
    w1, b1, w2, b2 = init_params(kp, nfeat, nhid)

    # Multi-tile path (tm = 128 -> 3 grid steps, exercises pipelining + ragged last tile).
    out_tiled = jax.block_until_ready(curvature_mlp(x, w1, b1, w2, b2))
    # Single-tile path (tm = 384 covers all rows in one grid step).
    out_single = jax.block_until_ready(curvature_mlp(x, w1, b1, w2, b2, target_tiles=1))

    ref = reference(x, w1, b1, w2, b2)

    assert out_tiled.shape == (n, 1) and out_single.shape == (n, 1)
    # f32 streaming with f32 accumulation; the 2e-2 slack only covers the case where
    # the tiny K=16 contraction is lowered through single-pass bf16 MXU feeds.
    assert jnp.allclose(out_tiled, ref, atol=2e-2, rtol=2e-2)
    assert jnp.allclose(out_single, ref, atol=2e-2, rtol=2e-2)
    # Tiling must not change the math (same per-lane computation).
    assert jnp.allclose(out_tiled, out_single, atol=1e-6, rtol=1e-6)
    assert bool(jnp.all((out_tiled > 0.0) & (out_tiled < 1.0)))
    print("KERNEL_OK")
</pallas_src>

<mosaic_0001>
module attributes {stable_mosaic.version = 11 : i64} {
  func.func @_curvature_mlp_kernel(%arg0: i32, %arg1: memref<128x16xf32, #tpu.memory_space<vmem>>, %arg2: memref<32x16xf32, #tpu.memory_space<vmem>>, %arg3: memref<32x1xf32, #tpu.memory_space<vmem>>, %arg4: memref<32x1xf32, #tpu.memory_space<vmem>>, %arg5: memref<1xf32, #tpu.memory_space<smem>>, %arg6: memref<1x128xf32, #tpu.memory_space<vmem>>) attributes {dimension_semantics = [#tpu.dimension_semantics<parallel>], iteration_bounds = array<i64: 3>, scalar_prefetch = 0 : i64, scratch_operands = 0 : i64, tpu.core_type = #tpu.core_type<tc>, window_params = [{transform_indices = @transform_0, window_bounds = array<i64: 128, 16>}, {pipeline_mode = #tpu.pipeline_mode<synchronous>, transform_indices = @transform_1, window_bounds = array<i64: 32, 16>}, {pipeline_mode = #tpu.pipeline_mode<synchronous>, transform_indices = @transform_2, window_bounds = array<i64: 32, 1>}, {pipeline_mode = #tpu.pipeline_mode<synchronous>, transform_indices = @transform_3, window_bounds = array<i64: 32, 1>}, {transform_indices = @transform_4, window_bounds = array<i64: 1>}, {transform_indices = @transform_5, window_bounds = array<i64: 1, 128>}]} {
    %c0 = arith.constant 0 : index
    %c0_0 = arith.constant 0 : index
    %0 = vector.load %arg2[%c0, %c0_0] : memref<32x16xf32, #tpu.memory_space<vmem>>, vector<32x16xf32>
    %c0_1 = arith.constant 0 : index
    %c0_2 = arith.constant 0 : index
    %1 = vector.load %arg1[%c0_1, %c0_2] : memref<128x16xf32, #tpu.memory_space<vmem>>, vector<128x16xf32>
    %cst = arith.constant dense<0.000000e+00> : vector<32x128xf32>
    %2 = tpu.matmul %0, %1, %cst {dimension_numbers = #tpu.dot_dimension_numbers<[1], [1], [0], [0], [0, 0, 1, 0], [], []>} : vector<32x16xf32>, vector<128x16xf32>, vector<32x128xf32> -> vector<32x128xf32>
    %c0_3 = arith.constant 0 : index
    %c0_4 = arith.constant 0 : index
    %3 = vector.load %arg3[%c0_3, %c0_4] : memref<32x1xf32, #tpu.memory_space<vmem>>, vector<32x1xf32>
    %4 = vector.broadcast %3 : vector<32x1xf32> to vector<32x128xf32>
    %5 = arith.addf %2, %4 : vector<32x128xf32>
    %cst_5 = arith.constant 0.000000e+00 : f32
    %6 = vector.broadcast %cst_5 : f32 to vector<32x128xf32>
    %7 = arith.maximumf %5, %6 : vector<32x128xf32>
    %c0_6 = arith.constant 0 : index
    %c0_7 = arith.constant 0 : index
    %8 = vector.load %arg4[%c0_6, %c0_7] : memref<32x1xf32, #tpu.memory_space<vmem>>, vector<32x1xf32>
    %9 = vector.broadcast %8 : vector<32x1xf32> to vector<32x128xf32>
    %10 = arith.mulf %7, %9 : vector<32x128xf32>
    %cst_8 = arith.constant dense<0.000000e+00> : vector<128xf32>
    %11 = vector.multi_reduction <add>, %10, %cst_8 [0] : vector<32x128xf32> to vector<128xf32>
    %12 = vector.shape_cast %11 : vector<128xf32> to vector<1x128xf32>
    %c0_9 = arith.constant 0 : index
    %13 = memref.load %arg5[%c0_9] : memref<1xf32, #tpu.memory_space<smem>>
    %14 = vector.broadcast %13 : f32 to vector<1x128xf32>
    %15 = arith.addf %12, %14 : vector<1x128xf32>
    %16 = arith.negf %15 : vector<1x128xf32>
    %17 = math.exp %16 : vector<1x128xf32>
    %cst_10 = arith.constant 1.000000e+00 : f32
    %18 = vector.broadcast %cst_10 : f32 to vector<1x128xf32>
    %19 = arith.addf %18, %17 : vector<1x128xf32>
    %20 = arith.divf %18, %19 : vector<1x128xf32>
    %c0_11 = arith.constant 0 : index
    %c0_12 = arith.constant 0 : index
    %21 = vector.load %arg6[%c0_11, %c0_12] : memref<1x128xf32, #tpu.memory_space<vmem>>, vector<1x128xf32>
    tpu.vector_store %arg6[%c0_11, %c0_12], %20 {strides = array<i32>} : memref<1x128xf32, #tpu.memory_space<vmem>>, vector<1x128xf32>,
    return
  }
  func.func @transform_0(%arg0: i32) -> (i32, i32) {
    %c0_i32 = arith.constant 0 : i32
    %c0_i32_0 = arith.constant 0 : i32
    return %arg0, %c0_i32 : i32, i32
  }
  func.func @transform_1(%arg0: i32) -> (i32, i32) {
    %c0_i32 = arith.constant 0 : i32
    %c0_i32_0 = arith.constant 0 : i32
    %c0_i32_1 = arith.constant 0 : i32
    return %c0_i32, %c0_i32_0 : i32, i32
  }
  func.func @transform_2(%arg0: i32) -> (i32, i32) {
    %c0_i32 = arith.constant 0 : i32
    %c0_i32_0 = arith.constant 0 : i32
    %c0_i32_1 = arith.constant 0 : i32
    return %c0_i32, %c0_i32_0 : i32, i32
  }
  func.func @transform_3(%arg0: i32) -> (i32, i32) {
    %c0_i32 = arith.constant 0 : i32
    %c0_i32_0 = arith.constant 0 : i32
    %c0_i32_1 = arith.constant 0 : i32
    return %c0_i32, %c0_i32_0 : i32, i32
  }
  func.func @transform_4(%arg0: i32) -> i32 {
    %c0_i32 = arith.constant 0 : i32
    %c0_i32_0 = arith.constant 0 : i32
    return %c0_i32 : i32
  }
  func.func @transform_5(%arg0: i32) -> (i32, i32) {
    %c0_i32 = arith.constant 0 : i32
    %c0_i32_0 = arith.constant 0 : i32
    return %c0_i32, %arg0 : i32, i32
  }
}

</mosaic_0001>

<bundles_post_ra>
// kernel: tpu_custom_call.1
= control target key start
LH: loop header
LB: loop body
LE: loop exit
PB: predicated region body
PF: predicated region fallthrough
CT: control target
= control target key end

     0   :  { %s939_s0 = inlined_call_operand.vmem [shape: f32[300,16], index: 0, kind: input, shape index: {}]   ;;  %s940_s1 = inlined_call_operand.vmem [shape: f32[32,16], index: 1, kind: input, shape index: {}]   ;;  %s941_s2 = inlined_call_operand.vmem [shape: f32[32,1], index: 2, kind: input, shape index: {}]   ;;  %s942_s3 = inlined_call_operand.vmem [shape: f32[32,1], index: 3, kind: input, shape index: {}]   ;;  %s943_s4 = inlined_call_operand.<no memory space> [shape: f32[1], index: 4, kind: input, shape index: {}]   ;;  %s944_s5 = inlined_call_operand.hbm [shape: f32[1,384], index: 5, kind: output, shape index: {}]  }
   0x1   :  { %10 = sst [smem:[#allocation2]] %s943_s4 }
   0x2   :  { %11 = vsyncpa [#allocation4], 0 }
   0x3   :  { %13 = vsyncpa [#allocation4 + $0x1], 0  ;;  %s733_s20 = smov 0   ;;  %s735_s21 = smov 0  }
   0x4   :  { %s737_s22 = smov 0   ;;  %s739_s23 = smov 0  }
   0x5 LB: > { %s754_s4 = sadd.s32 4294967295, %s697_s23   ;;  %s511_s24 = sadd.s32 4294967294, %s697_s23   ;;  %s697_s23 = sphi %s739_s23, %s950_s23   ;;  %s693_s22 = sphi %s737_s22, %s949_s22   ;;  %s689_s21 = sphi %s735_s21, %s948_s21   ;;  %s685_s20 = sphi %s733_s20, %s947_s20  }
   0x6   : > { %s758_s25 = sadd.s32 1, %s697_s23   ;;  %s136_s26 = sadd.s32 1, %s693_s22 }
   0x7   : > { %s133_s27 = ssub.s32 %s697_s23, %s758_s25  ;;  %p146_p0 = scmp.ne.s32.totalorder %s693_s22, %s689_s21 }
   0x8   : > { %p134_p1 = scmp.eq.s32.totalorder %s133_s27, 0  ;;  %p147_p2 = scmp.eq.s32.totalorder %s754_s4, 2 }
   0x9   : > { %p152_p3 = scmp.ne.s32.totalorder %s689_s21, %s685_s20  ;;  %p153_p4 = scmp.eq.s32.totalorder %s511_s24, 2 }
   0xa   : > { %s769_s28 = scalar_select %p134_p1, %s693_s22, %s136_s26  }
   0xb   : > { %p771_p5 = por %p147_p2, %p146_p0  ;;  %p775_p6 = por %p153_p4, %p152_p3 }
   0xc   : > { %p514_p7 = scmp.ge.s32.totalorder %s697_s23, 1  ;;  %p200_p8 = scmp.lt.s32.totalorder %s697_s23, 4 }
   0xe   : > { %p201_p9 = pnand %p514_p7, %p200_p8 }
   0xf   : > { %s515_s6 = sshll.u32 (!%p201_p9), %s754_s4, 4  ;;  %s420_s18 = sld [smem:[#allocation2]] (!%p201_p9) }
  0x10   : > { %204 = sbr.rel (%p201_p9) target bundleno = 276 (0x114), region = 40  ;;  %p236_p10 = scmp.lt.s32.totalorder (!%p201_p9), %s515_s6, 37 }
  0x11   : > { %s229_s19 = sand.u32 (!%p201_p9), 1, %s689_s21   ;;  %s452_s27 = scalar_lea.hbm (!%p201_p9), %s944_s5, %s754_s4 }
  0x12   : > { %s456_s8 = sshll.u32 (!%p201_p9), %s452_s27, 4  ;;  %s444_s9 = scalar_lea.sflag (!%p201_p9), [#allocation4], %s229_s19  ;;  %s457_s8 = int_to_ptr.hbm [resolvable:$true] %s456_s8 }
  0x13   : > { %s649_s4 = sshra.s32 (!%p201_p9), %s457_s8, 4  ;;  %s655_s14 = scalar_lea.hbm (!%p201_p9), %s944_s5, 3  ;;  %s650_s4 = int_to_ptr.hbm [resolvable:$true] %s649_s4 }
  0x14   : > { %s651_s11 = scalar_lea.hbm (!%p201_p9), %s650_s4, 1  ;;  %p656_p0 = scmp.lt.s32.totalorder (!%p201_p9), %s650_s4, %s944_s5 }
  0x15   : > { %s952_s6 = smov (!%p236_p10, %s515_s6), 37  ;;  %vm289_vm0 = vcmask 130048   ;;  %v265_v6 = vld [vmem:[%s941_s2] sm:$0xff]  ;;  %v699_v7 = vmov 0   ;;  %v267_v9 = vld [vmem:[%s941_s2 + $0x10] sm:$0xff]  ;;  %v266_v11 = vld [vmem:[%s941_s2 + $0x8] sm:$0xff]  ;;  %v421_v61 = vstv %s420_s18  ;;  %p652_p11 = scmp.ne.s32.totalorder %s650_s4, %s651_s11 }
  0x16   : > { %s516_s7 = sshll.u32 %s952_s6, 3  ;;  %628 = vset.pattern.permute.xlu0 %v699_v7  ;;  %629 = vset.pattern.permute.xlu1 %v699_v7  ;;  %v268_v13 = vld [vmem:[%s941_s2 + $0x18] sm:$0xff]  ;;  %v385_v14 = vld [vmem:[%s942_s3 + $0x10] sm:$0xff]  ;;  %v383_v15 = vld [vmem:[%s942_s3] sm:$0xff]  ;;  %s230_s6 = scalar_lea.vmem [#allocation3], %s229_s19 }
  0x17   : > { %s785_s10 = scalar_lea.vmem %s939_s0, %s516_s7  ;;  %271 = vperm.xlu0 %628, %v265_v6   ;;  %630 = vset.pattern.permute.xlu2 %v699_v7  ;;  %v386_v17 = vld [vmem:[%s942_s3 + $0x18] sm:$0xff]  ;;  %v384_v19 = vld [vmem:[%s942_s3 + $0x8] sm:$0xff]  ;;  %v245_v25 = vld [vmem:[%s940_s1] sm:$0xff]  ;;  %s454_s7 = sshll.u32 %s230_s6, 4  ;;  %s455_s7 = int_to_ptr.vmem [resolvable:$true] %s454_s7 }
  0x18   : > { %v264_v0 = vld [vmem:[%s785_s10 + $0x78] sm:$0xff]  ;;  %v263_v1 = vld [vmem:[%s785_s10 + $0x70] sm:$0xff]  ;;  %v262_v2 = vld [vmem:[%s785_s10 + $0x68] sm:$0xff]  ;;  %281 = vperm.xlu1 %629, %v267_v9   ;;  %389 = vperm.xlu2 %630, %v383_v15   ;;  %p653_p12 = pnand %p652_p11, %p771_p5  ;;  %p657_p1 = scmp.lt.s32.totalorder %s655_s14, %s651_s11 }
  0x19   : > { %517 = vmatpush.xpose.msk.msra.mxu0 %vm289_vm0, %v264_v0  ;;  %540 = vmatpush.xpose.msk.msra.mxu1 %vm289_vm0, %v264_v0  ;;  %v261_v3 = vld [vmem:[%s785_s10 + $0x60] sm:$0xff]  ;;  %v260_v4 = vld [vmem:[%s785_s10 + $0x58] sm:$0xff]  ;;  %v259_v5 = vld [vmem:[%s785_s10 + $0x50] sm:$0xff] }
  0x1a   : > { %541 = vmatpush.xpose.msk.msra.mxu2 %vm289_vm0, %v264_v0  ;;  %542 = vmatpush.xpose.msk.msra.mxu3 %vm289_vm0, %v264_v0  ;;  %v258_v8 = vld [vmem:[%s785_s10 + $0x48] sm:$0xff]  ;;  %v257_v10 = vld [vmem:[%s785_s10 + $0x40] sm:$0xff]  ;;  %v256_v12 = vld [vmem:[%s785_s10 + $0x38] sm:$0xff]  ;;  %p654_p13 = pneg %p653_p12  ;;  %p658_p2 = por %p657_p1, %p656_p0 }
  0x1b   : > { %v255_v16 = vld [vmem:[%s785_s10 + $0x30] sm:$0xff]  ;;  %v254_v18 = vld [vmem:[%s785_s10 + $0x28] sm:$0xff]  ;;  %v253_v20 = vld [vmem:[%s785_s10 + $0x20] sm:$0xff] }
  0x1c   : > { %v252_v21 = vld [vmem:[%s785_s10 + $0x18] sm:$0xff]  ;;  %v251_v22 = vld [vmem:[%s785_s10 + $0x10] sm:$0xff]  ;;  %v250_v23 = vld [vmem:[%s785_s10 + $0x8] sm:$0xff]  ;;  %p659_p3 = pnand %p658_p2, %p654_p13 }
  0x1d   : > { %518 = vmatpush.xpose.msk.msra.mxu0 %vm289_vm0, %v263_v1  ;;  %543 = vmatpush.xpose.msk.msra.mxu1 %vm289_vm0, %v263_v1  ;;  %v249_v24 = vld [vmem:[%s785_s10] sm:$0xff]  ;;  %v246_v26 = vld [vmem:[%s940_s1 + $0x8] sm:$0xff]  ;;  %v247_v27 = vld [vmem:[%s940_s1 + $0x10] sm:$0xff] }
  0x1e   : > { %544 = vmatpush.xpose.msk.msra.mxu2 %vm289_vm0, %v263_v1  ;;  %545 = vmatpush.xpose.msk.msra.mxu3 %vm289_vm0, %v263_v1  ;;  %v248_v28 = vld [vmem:[%s940_s1 + $0x18] sm:$0xff] }
  0x1f   : > { %276 = vperm.xlu0 %628, %v266_v11  }
  0x20   : > { %286 = vperm.xlu1 %629, %v268_v13   ;;  %394 = vperm.xlu2 %630, %v384_v19  }
  0x21   : > { %519 = vmatpush.xpose.msk.msra.mxu0 %vm289_vm0, %v262_v2  ;;  %546 = vmatpush.xpose.msk.msra.mxu1 %vm289_vm0, %v262_v2 }
  0x22   : > { %547 = vmatpush.xpose.msk.msra.mxu2 %vm289_vm0, %v262_v2  ;;  %548 = vmatpush.xpose.msk.msra.mxu3 %vm289_vm0, %v262_v2 }
  0x25   : > { %520 = vmatpush.xpose.msk.msra.mxu0 %vm289_vm0, %v261_v3  ;;  %549 = vmatpush.xpose.msk.msra.mxu1 %vm289_vm0, %v261_v3 }
  0x26   : > { %550 = vmatpush.xpose.msk.msra.mxu2 %vm289_vm0, %v261_v3  ;;  %551 = vmatpush.xpose.msk.msra.mxu3 %vm289_vm0, %v261_v3 }
  0x27   : > { %399 = vperm.xlu0 %628, %v385_v14  }
  0x28   : > { %404 = vperm.xlu1 %629, %v386_v17  }
  0x29   : > { %521 = vmatpush.xpose.msk.msra.mxu0 %vm289_vm0, %v260_v4  ;;  %552 = vmatpush.xpose.msk.msra.mxu1 %vm289_vm0, %v260_v4 }
  0x2a   : > { %553 = vmatpush.xpose.msk.msra.mxu2 %vm289_vm0, %v260_v4  ;;  %554 = vmatpush.xpose.msk.msra.mxu3 %vm289_vm0, %v260_v4 }
  0x2d   : > { %522 = vmatpush.xpose.msk.msra.mxu0 %vm289_vm0, %v259_v5  ;;  %555 = vmatpush.xpose.msk.msra.mxu1 %vm289_vm0, %v259_v5 }
  0x2e   : > { %556 = vmatpush.xpose.msk.msra.mxu2 %vm289_vm0, %v259_v5  ;;  %557 = vmatpush.xpose.msk.msra.mxu3 %vm289_vm0, %v259_v5 }
  0x31   : > { %523 = vmatpush.xpose.msk.msra.mxu0 %vm289_vm0, %v258_v8  ;;  %558 = vmatpush.xpose.msk.msra.mxu1 %vm289_vm0, %v258_v8 }
  0x32   : > { %559 = vmatpush.xpose.msk.msra.mxu2 %vm289_vm0, %v258_v8  ;;  %560 = vmatpush.xpose.msk.msra.mxu3 %vm289_vm0, %v258_v8 }
  0x35   : > { %524 = vmatpush.xpose.msk.msra.mxu0 %vm289_vm0, %v257_v10  ;;  %561 = vmatpush.xpose.msk.msra.mxu1 %vm289_vm0, %v257_v10 }
  0x36   : > { %562 = vmatpush.xpose.msk.msra.mxu2 %vm289_vm0, %v257_v10  ;;  %563 = vmatpush.xpose.msk.msra.mxu3 %vm289_vm0, %v257_v10 }
  0x39   : > { %525 = vmatpush.xpose.msk.msra.mxu0 %vm289_vm0, %v256_v12  ;;  %564 = vmatpush.xpose.msk.msra.mxu1 %vm289_vm0, %v256_v12 }
  0x3a   : > { %565 = vmatpush.xpose.msk.msra.mxu2 %vm289_vm0, %v256_v12  ;;  %566 = vmatpush.xpose.msk.msra.mxu3 %vm289_vm0, %v256_v12 }
  0x3d   : > { %526 = vmatpush.xpose.msk.msra.mxu0 %vm289_vm0, %v255_v16  ;;  %567 = vmatpush.xpose.msk.msra.mxu1 %vm289_vm0, %v255_v16 }
  0x3e   : > { %568 = vmatpush.xpose.msk.msra.mxu2 %vm289_vm0, %v255_v16  ;;  %569 = vmatpush.xpose.msk.msra.mxu3 %vm289_vm0, %v255_v16 }
  0x41   : > { %527 = vmatpush.xpose.msk.msra.mxu0 %vm289_vm0, %v254_v18  ;;  %570 = vmatpush.xpose.msk.msra.mxu1 %vm289_vm0, %v254_v18 }
  0x42   : > { %571 = vmatpush.xpose.msk.msra.mxu2 %vm289_vm0, %v254_v18  ;;  %572 = vmatpush.xpose.msk.msra.mxu3 %vm289_vm0, %v254_v18 }
  0x45   : > { %528 = vmatpush.xpose.msk.msra.mxu0 %vm289_vm0, %v253_v20  ;;  %573 = vmatpush.xpose.msk.msra.mxu1 %vm289_vm0, %v253_v20 }
  0x46   : > { %574 = vmatpush.xpose.msk.msra.mxu2 %vm289_vm0, %v253_v20  ;;  %575 = vmatpush.xpose.msk.msra.mxu3 %vm289_vm0, %v253_v20 }
  0x49   : > { %529 = vmatpush.xpose.msk.msra.mxu0 %vm289_vm0, %v252_v21  ;;  %576 = vmatpush.xpose.msk.msra.mxu1 %vm289_vm0, %v252_v21 }
  0x4a   : > { %577 = vmatpush.xpose.msk.msra.mxu2 %vm289_vm0, %v252_v21  ;;  %578 = vmatpush.xpose.msk.msra.mxu3 %vm289_vm0, %v252_v21 }
  0x4d   : > { %530 = vmatpush.xpose.msk.msra.mxu0 %vm289_vm0, %v251_v22  ;;  %579 = vmatpush.xpose.msk.msra.mxu1 %vm289_vm0, %v251_v22 }
  0x4e   : > { %580 = vmatpush.xpose.msk.msra.mxu2 %vm289_vm0, %v251_v22  ;;  %581 = vmatpush.xpose.msk.msra.mxu3 %vm289_vm0, %v251_v22 }
  0x51   : > { %531 = vmatpush.xpose.msk.msra.mxu0 %vm289_vm0, %v250_v23  ;;  %582 = vmatpush.xpose.msk.msra.mxu1 %vm289_vm0, %v250_v23 }
  0x52   : > { %583 = vmatpush.xpose.msk.msra.mxu2 %vm289_vm0, %v250_v23  ;;  %584 = vmatpush.xpose.msk.msra.mxu3 %vm289_vm0, %v250_v23 }
  0x55   : > { %532 = vmatpush.xpose.msk.msra.mxu0 %vm289_vm0, %v249_v24  ;;  %585 = vmatpush.xpose.msk.msra.mxu1 %vm289_vm0, %v249_v24 }
  0x56   : > { %586 = vmatpush.xpose.msk.msra.mxu2 %vm289_vm0, %v249_v24  ;;  %587 = vmatpush.xpose.msk.msra.mxu3 %vm289_vm0, %v249_v24 }
  0x58   : > { %533 = vmatmul.msk.f32.vlgmr.msra.gmra.mxu0 %vm289_vm0, %v245_v25  ;;  %534 = vmatmul.msk.f32.vlgmr.msra.gmra.mxu1 %vm289_vm0, %v246_v26 }
  0x59   : > { %535 = vmatmul.msk.f32.vlgmr.msra.gmra.mxu2 %vm289_vm0, %v247_v27  ;;  %536 = vmatmul.msk.f32.vlgmr.msra.gmra.mxu3 %vm289_vm0, %v248_v28 }
  0x72   : > { %v390_v31 = vpop.permute.xlu2 %389 }
  0x7a   : > { %v395_v40 = vpop.permute.xlu2 %394 }
  0x89   : > { %v272_v29 = vpop.permute.xlu0 %271 }
  0x8a   : > { %v282_v30 = vpop.permute.xlu1 %281 }
  0x91   : > { %v277_v32 = vpop.permute.xlu0 %276 }
  0x92   : > { %v287_v37 = vpop.permute.xlu1 %286 }
  0x99   : > { %v400_v49 = vpop.permute.xlu0 %399 }
  0x9a   : > { %v405_v52 = vpop.permute.xlu1 %404 }
  0xd5   : > { %v367_v33 = vpop.f32.mrf.mxu0  ;;  %v370_v34 = vpop.f32.mrf.mxu1 }
  0xd6   : > { %v368_v35 = vadd.f32 %v367_v33, %v272_v29  ;;  %v371_v36 = vadd.f32 %v370_v34, %v277_v32 }
  0xd8   : > { %v379_v38 = vmax.f32 %v368_v35, 0.0  ;;  %v380_v39 = vmax.f32 %v371_v36, 0.0 }
  0xda   : > { %v407_v43 = vmul.f32 %v390_v31, %v379_v38  ;;  %v408_v44 = vmul.f32 %v395_v40, %v380_v39 }
  0xdc   : > { %v373_v41 = vpop.f32.mrf.mxu2  ;;  %v376_v42 = vpop.f32.mrf.mxu3  ;;  %v411_v50 = vadd.f32 %v408_v44, %v407_v43 }
  0xdd   : > { %v374_v45 = vadd.f32 %v373_v41, %v282_v30  ;;  %v377_v46 = vadd.f32 %v376_v42, %v287_v37 }
  0xdf   : > { %v381_v47 = vmax.f32 %v374_v45, 0.0  ;;  %v382_v48 = vmax.f32 %v377_v46, 0.0 }
  0xe1   : > { %v409_v51 = vmul.f32 %v400_v49, %v381_v47  ;;  %v410_v54 = vmul.f32 %v405_v52, %v382_v48 }
  0xe3   : > { %v412_v53 = vadd.f32 %v411_v50, %v409_v51 }
  0xe5   : > { %v413_v55 = vadd.f32 %v412_v53, %v410_v54 }
  0xe7   : > { %v414_v56 = vrot.slane %v413_v55, 4 }
  0xe9   : > { %v415_v57 = vadd.f32 %v414_v56, %v413_v55 }
  0xeb   : > { %v416_v58 = vrot.slane %v415_v57, 2 }
  0xed   : > { %v417_v59 = vadd.f32 %v416_v58, %v415_v57 }
  0xef   : > { %v418_v60 = vrot.slane %v417_v59, 1 }
  0xf1   : > { %v419_v62 = vadd.f32 %v418_v60, %v417_v59 }
  0xf3   : > { %v422_v63 = vadd.f32 %v421_v61, %v419_v62 }
  0xf5   : > { %v537_v0 = vmul.f32 -1.442695, %v422_v63 }
  0xf7   : > { %631 = vpow2.f32 %v537_v0 }
  0xfd   : > { %v632_v1 = vpop.eup %631 }
  0xfe   : > { %v426_v2 = vadd.f32 1.0, %v632_v1 }
 0x100   : > { %633 = vrcp.f32 %v426_v2  ;;  %v438_v6 = vand.u32 2147483648, %v426_v2  ;;  %v436_v8 = vand.u32 2147483647, %v426_v2  ;;  %vm432_vm2 = vweird.f32 %v426_v2 }
 0x102   : > { %v439_v10 = vor.u32 1.1754944e-38, %v438_v6  ;;  %vm437_vm4 = vcmp.eq.f32.partialorder %v436_v8, 8.507059e+37 }
 0x106   : > { %v634_v3 = vpop.eup %633 }
 0x107   : > { %v428_v4 = vmul.f32 %v634_v3, %v426_v2  ;;  %vm433_vm1 = vweird.f32 %v634_v3 }
 0x108   : > { %vm434_vm3 = vmor %vm432_vm2, %vm433_vm1 }
 0x109   : > { %v429_v5 = vsub.f32 1.0, %v428_v4 }
 0x10b   : > { %v430_v7 = vmul.f32 %v634_v3, %v429_v5 }
 0x10d   : > { %v431_v9 = vadd.f32 %v634_v3, %v430_v7 }
 0x10f   : > { %v435_v11 = vsel %vm434_vm3, %v634_v3, %v431_v9 }
 0x110   : > { %v440_v12 = vsel %vm437_vm4, %v439_v10, %v435_v11 }
 0x111   : > { %442 = vst [vmem:[%s230_s6] sm:$0x1] %v440_v12 }
 0x112   : > { %662 = shalt.err (!%p659_p3)
}
 0x113   : > { %588 = dma.vmem_to_hbm [thread:$0]  (%p771_p5), %s455_s7, 16, %s457_s8, %s444_s9  }
 0x114 PF: > { %p594_p4 = scmp.ge.s32.totalorder %s697_s23, 2  ;;  %s468_s10 = sand.u32 1, %s685_s20  }
 0x115   : > { %s469_s17 = scalar_lea.sflag [#allocation4], %s468_s10 }
 0x116   : > { %p591_p7 = pnand %p594_p4, %p775_p6 }
 0x118   : > { %p592_p8 = pneg %p591_p7 }
 0x11a   : > { %680 = dma.done.wait (%p592_p8), %s469_s17, 16  }
 0x11b   : > { %682 = vsyncadd (%p592_p8), %s469_s17, 4294967280  ;;  %p16_p9 = scmp.ge.s32.totalorder %s758_s25, 5   ;;  %s947_s20 = smov %s689_s21 }
 0x11c   : > { %s948_s21 = smov %s693_s22  ;;  %s949_s22 = smov %s769_s28 }
 0x11d   : > { %s950_s23 = smov %s758_s25  ;;  %18 = sbr.rel (!%p16_p9) target bundleno = 5 (0x5), region = 75 }
 0x122   :  { %474 = vsyncpa [#allocation4], 1 }
 0x123   :  { %476 = vsyncpa [#allocation4 + $0x1], 1 }

</bundles_post_ra>
